<compile_context>
chip_gen: v6e
topology: v6e:2x2x1
jax: 0.10.0
libtpu: 0.0.40
codegen_flags: <defaults>
</compile_context>

<pallas_src>
import jax
import jax.numpy as jnp
from jax.experimental import pallas as pl
from jax.experimental.pallas import tpu as pltpu

LANE = 128


def _round_up(n, m):
    return (n + m - 1) // m * m


def _mlp_kernel(x_ref, w1_ref, b1_ref, w2_ref, b2_ref, o_ref):
    # x: (tb, in_dim) bf16, w1: (in_dim, hidden_p) bf16  -> MXU, f32 accumulate
    h = jnp.dot(x_ref[...], w1_ref[...], preferred_element_type=jnp.float32)
    h = h + b1_ref[...]                      # f32 bias add (VPU)
    h = jnp.maximum(h, 0.0)                  # f32 ReLU (VPU)
    # second matmul: feed bf16 to the MXU again, accumulate in f32
    out = jnp.dot(h.astype(jnp.bfloat16), w2_ref[...],
                  preferred_element_type=jnp.float32)
    out = out + b2_ref[...]                  # (tb, classes) + (1, classes)
    o_ref[...] = out.astype(o_ref.dtype)


def prepare_params(w1, b1, w2, b2, weight_dtype=jnp.bfloat16):
    """One-time prep: pad hidden to a multiple of 128 and cast weights to bf16."""
    in_dim, hidden = w1.shape
    classes = w2.shape[1]
    hidden_p = _round_up(hidden, LANE)
    pad = hidden_p - hidden
    w1p = jnp.pad(w1, ((0, 0), (0, pad))).astype(weight_dtype)
    b1p = jnp.pad(jnp.reshape(b1, (1, hidden)), ((0, 0), (0, pad))).astype(jnp.float32)
    w2p = jnp.pad(w2, ((0, pad), (0, 0))).astype(weight_dtype)
    b2p = jnp.reshape(b2, (1, classes)).astype(jnp.float32)
    return w1p, b1p, w2p, b2p


@jax.jit
def neural_net_forward(x, w1p, b1p, w2p, b2p):
    """Forward pass of NeuralNet with prepared (padded, bf16) params."""
    batch, in_dim = x.shape
    hidden_p = w1p.shape[1]
    classes = w2p.shape[1]

    x_bf = x.astype(w1p.dtype)

    # Weight BlockSpecs: full-extent blocks (each grid step / core keeps its
    # own resident copy). Batch tiling only when the batch is large enough to
    # amortize the ~0.35 us/step overhead and split across TensorCores.
    if batch >= 512 and batch % 256 == 0:
        tb = 256
        grid = (batch // tb,)
        in_specs = [
            pl.BlockSpec((tb, in_dim), lambda i: (i, 0)),
            pl.BlockSpec((in_dim, hidden_p), lambda i: (0, 0)),
            pl.BlockSpec((1, hidden_p), lambda i: (0, 0)),
            pl.BlockSpec((hidden_p, classes), lambda i: (0, 0)),
            pl.BlockSpec((1, classes), lambda i: (0, 0)),
        ]
        out_specs = pl.BlockSpec((tb, classes), lambda i: (i, 0))
        compiler_params = pltpu.CompilerParams(
            dimension_semantics=("parallel",),
            vmem_limit_bytes=8 << 20,
        )
    else:
        grid = ()
        in_specs = [
            pl.BlockSpec((batch, in_dim), lambda: (0, 0)),
            pl.BlockSpec((in_dim, hidden_p), lambda: (0, 0)),
            pl.BlockSpec((1, hidden_p), lambda: (0, 0)),
            pl.BlockSpec((hidden_p, classes), lambda: (0, 0)),
            pl.BlockSpec((1, classes), lambda: (0, 0)),
        ]
        out_specs = pl.BlockSpec((batch, classes), lambda: (0, 0))
        compiler_params = pltpu.CompilerParams(vmem_limit_bytes=8 << 20)

    return pl.pallas_call(
        _mlp_kernel,
        out_shape=jax.ShapeDtypeStruct((batch, classes), x.dtype),
        grid=grid,
        in_specs=in_specs,
        out_specs=out_specs,
        compiler_params=compiler_params,
    )(x_bf, w1p, b1p, w2p, b2p)


def init_params(key, input_size, hidden_size, num_classes, dtype=jnp.float32):
    """Deterministic init mimicking nn.Linear default: U(-1/sqrt(fan_in), 1/sqrt(fan_in))."""
    k1, k2, k3, k4 = jax.random.split(key, 4)
    bound1 = 1.0 / (input_size ** 0.5)
    bound2 = 1.0 / (hidden_size ** 0.5)
    w1 = jax.random.uniform(k1, (input_size, hidden_size), dtype,
                            minval=-bound1, maxval=bound1)
    b1 = jax.random.uniform(k2, (1, hidden_size), dtype,
                            minval=-bound1, maxval=bound1)
    w2 = jax.random.uniform(k3, (hidden_size, num_classes), dtype,
                            minval=-bound2, maxval=bound2)
    b2 = jax.random.uniform(k4, (1, num_classes), dtype,
                            minval=-bound2, maxval=bound2)
    return w1, b1, w2, b2


if __name__ == "__main__":
    input_size = 784
    hidden_size = 500
    num_classes = 10
    batch = 8

    key = jax.random.PRNGKey(0)
    kx, kp = jax.random.split(key)
    x = jax.random.normal(kx, (batch, input_size), jnp.float32)
    w1, b1, w2, b2 = init_params(kp, input_size, hidden_size, num_classes)
    w1p, b1p, w2p, b2p = prepare_params(w1, b1, w2, b2)

    out = neural_net_forward(x, w1p, b1p, w2p, b2p)
    out = jax.block_until_ready(out)
    assert out.shape == (batch, num_classes)

    # Tight check vs a reference with the SAME bf16 quantization of x / weights
    # (only f32-accumulation-order differences remain).
    xq = x.astype(jnp.bfloat16).astype(jnp.float32)
    w1q = w1.astype(jnp.bfloat16).astype(jnp.float32)
    w2q = w2.astype(jnp.bfloat16).astype(jnp.float32)
    hq = jnp.maximum(xq @ w1q + b1, 0.0)
    ref_q = hq.astype(jnp.bfloat16).astype(jnp.float32) @ w2q + b2
    assert jnp.allclose(out, ref_q, atol=2e-3, rtol=2e-3)

    # Loose sanity check vs the full-f32 PyTorch-equivalent forward
    # (difference is just bf16 quantization of x / weights / hidden).
    ref_f32 = jnp.maximum(x @ w1 + b1, 0.0) @ w2 + b2
    assert jnp.allclose(out, ref_f32, atol=5e-2, rtol=5e-2)

    print("KERNEL_OK")
</pallas_src>

<mosaic_0001>
module attributes {stable_mosaic.version = 11 : i64} {
  func.func @_mlp_kernel(%arg0: memref<8x784xbf16, #tpu.memory_space<vmem>>, %arg1: memref<784x512xbf16, #tpu.memory_space<vmem>>, %arg2: memref<1x512xf32, #tpu.memory_space<vmem>>, %arg3: memref<512x10xbf16, #tpu.memory_space<vmem>>, %arg4: memref<1x10xf32, #tpu.memory_space<vmem>>, %arg5: memref<8x10xf32, #tpu.memory_space<vmem>>) attributes {dimension_semantics = [], scalar_prefetch = 0 : i64, scratch_operands = 0 : i64, tpu.core_type = #tpu.core_type<tc>} {
    %c0 = arith.constant 0 : index
    %c0_0 = arith.constant 0 : index
    %0 = vector.load %arg0[%c0, %c0_0] : memref<8x784xbf16, #tpu.memory_space<vmem>>, vector<8x784xbf16>
    %c0_1 = arith.constant 0 : index
    %c0_2 = arith.constant 0 : index
    %1 = vector.load %arg1[%c0_1, %c0_2] : memref<784x512xbf16, #tpu.memory_space<vmem>>, vector<784x512xbf16>
    %cst = arith.constant dense<0.000000e+00> : vector<8x512xf32>
    %2 = tpu.matmul %0, %1, %cst {dimension_numbers = #tpu.dot_dimension_numbers<[1], [0], [0], [1], [0, 0, 1, 1], [], []>} : vector<8x784xbf16>, vector<784x512xbf16>, vector<8x512xf32> -> vector<8x512xf32>
    %c0_3 = arith.constant 0 : index
    %c0_4 = arith.constant 0 : index
    %3 = vector.load %arg2[%c0_3, %c0_4] : memref<1x512xf32, #tpu.memory_space<vmem>>, vector<1x512xf32>
    %4 = vector.broadcast %3 : vector<1x512xf32> to vector<8x512xf32>
    %5 = arith.addf %2, %4 : vector<8x512xf32>
    %cst_5 = arith.constant 0.000000e+00 : f32
    %6 = vector.broadcast %cst_5 : f32 to vector<8x512xf32>
    %7 = arith.maximumf %5, %6 : vector<8x512xf32>
    %8 = arith.truncf %7 : vector<8x512xf32> to vector<8x512xbf16>
    %c0_6 = arith.constant 0 : index
    %c0_7 = arith.constant 0 : index
    %9 = vector.load %arg3[%c0_6, %c0_7] : memref<512x10xbf16, #tpu.memory_space<vmem>>, vector<512x10xbf16>
    %cst_8 = arith.constant dense<0.000000e+00> : vector<8x10xf32>
    %10 = tpu.matmul %8, %9, %cst_8 {dimension_numbers = #tpu.dot_dimension_numbers<[1], [0], [0], [1], [0, 0, 1, 1], [], []>} : vector<8x512xbf16>, vector<512x10xbf16>, vector<8x10xf32> -> vector<8x10xf32>
    %c0_9 = arith.constant 0 : index
    %c0_10 = arith.constant 0 : index
    %11 = vector.load %arg4[%c0_9, %c0_10] : memref<1x10xf32, #tpu.memory_space<vmem>>, vector<1x10xf32>
    %12 = vector.broadcast %11 : vector<1x10xf32> to vector<8x10xf32>
    %13 = arith.addf %10, %12 : vector<8x10xf32>
    %c0_11 = arith.constant 0 : index
    %c0_12 = arith.constant 0 : index
    %14 = vector.load %arg5[%c0_11, %c0_12] : memref<8x10xf32, #tpu.memory_space<vmem>>, vector<8x10xf32>
    tpu.vector_store %arg5[%c0_11, %c0_12], %13 {strides = array<i32>} : memref<8x10xf32, #tpu.memory_space<vmem>>, vector<8x10xf32>,
    return
  }
}

</mosaic_0001>

<bundles_post_ra>
// kernel: neural_net_forward.1
= control target key start
LH: loop header
LB: loop body
LE: loop exit
PB: predicated region body
PF: predicated region fallthrough
CT: control target
= control target key end

     0   :  { %10 = vsyncpa [#allocation3], 0  ;;  %s2819_s0 = inlined_call_operand.vmem [shape: bf16[8,784], index: 0, kind: input, shape index: {}]   ;;  %s2820_s1 = inlined_call_operand.hbm [shape: bf16[784,512], index: 1, kind: input, shape index: {}]   ;;  %s2821_s2 = inlined_call_operand.vmem [shape: f32[1,512], index: 2, kind: input, shape index: {}]   ;;  %s2822_s3 = inlined_call_operand.vmem [shape: bf16[512,10], index: 3, kind: input, shape index: {}]   ;;  %s2823_s4 = inlined_call_operand.vmem [shape: f32[1,10], index: 4, kind: input, shape index: {}]   ;;  %s2824_s5 = inlined_call_operand.hbm [shape: f32[8,10], index: 5, kind: output, shape index: {}]  }
   0x1   :  { %11 = vsyncpa [#allocation4], 0  ;;  %s2626_s18 = smov [#allocation2]  }
   0x2   :  { %s19_s19 = sshll.u32 %s2626_s18, 4  ;;  %s20_s19 = int_to_ptr.vmem [resolvable:$true] %s19_s19 }
   0x3   :  { %s2590_s20 = scalar_lea.vmem %s20_s19, 25088  ;;  %p2595_p1 = scmp.lt.s32.totalorder %s20_s19, %s20_s19 }
   0x4   :  { %p2591_p0 = scmp.ne.s32.totalorder %s20_s19, %s2590_s20  ;;  %p2596_p2 = scmp.lt.s32.totalorder %s2590_s20, %s2590_s20 }
   0x6   :  { %p2597_p3 = por %p2596_p2, %p2595_p1 }
   0x8   :  { %p2598_p4 = pnand %p2597_p3, %p2591_p0 }
   0xa   :  { %2601 = shalt.err (!%p2598_p4)
}
   0xb   :  { %s2627_s21 = smov 256   ;;  %s2628_s22 = smov 16  }
   0xc   :  { %25 = dma.hbm_to_vmem [thread:$0]  %s2820_s1, 25088, %s20_s19, [#allocation3], %s2627_s21, %s2627_s21, %s2628_s22  }
   0xd   :  { %2622 = dma.done.wait [#allocation3], 25088  }
   0xe   :  { %2623 = vsyncadd [#allocation3], 4294942208  ;;  %v2249_v0 = vld [vmem:[#allocation2 + $0xe4] ss:$16 sps:$4 sm:$0xff]   ;;  %v2253_v2 = vld [vmem:[#allocation2 + $0xe0] ss:$16 sps:$4 sm:$0xff]  }
   0xf   :  { %v2251_v1 = vld [vmem:[#allocation2 + $0x2e4] ss:$16 sps:$4 sm:$0xff]   ;;  %1266 = vmatprep.subr.bf16.mxu0 %v2249_v0  ;;  %v2254_v3 = vld [vmem:[#allocation2 + $0x2e0] ss:$16 sps:$4 sm:$0xff]   ;;  %v37_v48 = vld [vmem:[%s2819_s0 + $0x8] sm:$0xff]  ;;  %vm1262_vm0 = vcmask 130048  }
  0x10   :  { %1307 = vmatprep.subr.bf16.mxu1 %v2251_v1  ;;  %v2255_v4 = vld [vmem:[#allocation2 + $0xc4] ss:$16 sps:$4 sm:$0xff]   ;;  %1267 = vmatpush1.bf16.msra.mxu0 %v2253_v2  ;;  %v2259_v6 = vld [vmem:[#allocation2 + $0xc0] ss:$16 sps:$4 sm:$0xff]   ;;  %v2672_v51 = vcombine.high %v37_v48, %v37_v48  ;;  %s2630_s18 = smov [#allocation5]   ;;  %vm1945_vm1 = vcmask 80896  }
  0x11   :  { %1308 = vmatpush1.bf16.msra.mxu1 %v2254_v3  ;;  %v2257_v5 = vld [vmem:[#allocation2 + $0x2c4] ss:$16 sps:$4 sm:$0xff]   ;;  %1268 = vmatprep.subr.bf16.mxu0 %v2255_v4  ;;  %v2260_v7 = vld [vmem:[#allocation2 + $0x2c0] ss:$16 sps:$4 sm:$0xff]   ;;  %s1953_s19 = sshll.u32 %s2630_s18, 4  ;;  %s1954_s19 = int_to_ptr.vmem [resolvable:$true] %s1953_s19 }
  0x12   :  { %1309 = vmatprep.subr.bf16.mxu1 %v2257_v5  ;;  %v2261_v8 = vld [vmem:[#allocation2 + $0xa4] ss:$16 sps:$4 sm:$0xff]   ;;  %v2265_v10 = vld [vmem:[#allocation2 + $0xa0] ss:$16 sps:$4 sm:$0xff]   ;;  %1339 = vmatprep.mubr.bf16.mxu1 %v2672_v51  ;;  %s2602_s20 = scalar_lea.vmem %s1954_s19, 128  ;;  %p2607_p6 = scmp.lt.s32.totalorder %s1954_s19, %s1954_s19 }
  0x13   :  { %v2263_v9 = vld [vmem:[#allocation2 + $0x2a4] ss:$16 sps:$4 sm:$0xff]   ;;  %v2266_v11 = vld [vmem:[#allocation2 + $0x2a0] ss:$16 sps:$4 sm:$0xff]   ;;  %p2603_p5 = scmp.ne.s32.totalorder %s1954_s19, %s2602_s20  ;;  %p2608_p7 = scmp.lt.s32.totalorder %s2602_s20, %s2602_s20 }
  0x14   :  { %1269 = vmatpush1.bf16.msra.mxu0 %v2259_v6  ;;  %v2267_v12 = vld [vmem:[#allocation2 + $0x84] ss:$16 sps:$4 sm:$0xff]   ;;  %v2271_v14 = vld [vmem:[#allocation2 + $0x80] ss:$16 sps:$4 sm:$0xff]  }
  0x15   :  { %1310 = vmatpush1.bf16.msra.mxu1 %v2260_v7  ;;  %1270 = vmatprep.subr.bf16.mxu0 %v2261_v8  ;;  %v2269_v13 = vld [vmem:[#allocation2 + $0x284] ss:$16 sps:$4 sm:$0xff]   ;;  %v2272_v15 = vld [vmem:[#allocation2 + $0x280] ss:$16 sps:$4 sm:$0xff]   ;;  %v2678_v7 = vcombine.low %v37_v48, %v37_v48  ;;  %v2409_v48 = vld [vmem:[#allocation2 + $0x1ec] ss:$16 sps:$4 sm:$0xff]   ;;  %p2609_p8 = por %p2608_p7, %p2607_p6 }
  0x16   :  { %1311 = vmatprep.subr.bf16.mxu1 %v2263_v9  ;;  %v2273_v16 = vld [vmem:[#allocation2 + $0x64] ss:$16 sps:$4 sm:$0xff]   ;;  %v2277_v18 = vld [vmem:[#allocation2 + $0x60] ss:$16 sps:$4 sm:$0xff]  }
  0x17   :  { %v2275_v17 = vld [vmem:[#allocation2 + $0x264] ss:$16 sps:$4 sm:$0xff]   ;;  %v2278_v19 = vld [vmem:[#allocation2 + $0x260] ss:$16 sps:$4 sm:$0xff]   ;;  %p2610_p9 = pnand %p2609_p8, %p2603_p5 }
  0x18   :  { %1271 = vmatpush1.bf16.msra.mxu0 %v2265_v10  ;;  %v2279_v20 = vld [vmem:[#allocation2 + $0x44] ss:$16 sps:$4 sm:$0xff]   ;;  %v2283_v22 = vld [vmem:[#allocation2 + $0x40] ss:$16 sps:$4 sm:$0xff]  }
  0x19   :  { %1312 = vmatpush1.bf16.msra.mxu1 %v2266_v11  ;;  %1272 = vmatprep.subr.bf16.mxu0 %v2267_v12  ;;  %v2281_v21 = vld [vmem:[#allocation2 + $0x244] ss:$16 sps:$4 sm:$0xff]   ;;  %v2284_v23 = vld [vmem:[#allocation2 + $0x240] ss:$16 sps:$4 sm:$0xff]   ;;  %v2360_v11 = vld [vmem:[#allocation2 + $0xec] ss:$16 sps:$4 sm:$0xff]  }
  0x1a   :  { %1313 = vmatprep.subr.bf16.mxu1 %v2269_v13  ;;  %v2285_v24 = vld [vmem:[#allocation2 + $0x24] ss:$16 sps:$4 sm:$0xff]   ;;  %v2289_v26 = vld [vmem:[#allocation2 + $0x20] ss:$16 sps:$4 sm:$0xff]   ;;  %v2629_v13 = vmov 0  }
  0x1b   :  { %v2287_v25 = vld [vmem:[#allocation2 + $0x224] ss:$16 sps:$4 sm:$0xff]   ;;  %v2290_v27 = vld [vmem:[#allocation2 + $0x220] ss:$16 sps:$4 sm:$0xff]  }
  0x1c   :  { %1273 = vmatpush1.bf16.msra.mxu0 %v2271_v14  ;;  %v2291_v28 = vld [vmem:[#allocation2 + $0x4] ss:$16 sps:$4 sm:$0xff]   ;;  %v2295_v30 = vld [vmem:[#allocation2] ss:$16 sps:$4 sm:$0xff]  }
  0x1d   :  { %1314 = vmatpush1.bf16.msra.mxu1 %v2272_v15  ;;  %1274 = vmatprep.subr.bf16.mxu0 %v2273_v16  ;;  %v2293_v29 = vld [vmem:[#allocation2 + $0x204] ss:$16 sps:$4 sm:$0xff]   ;;  %v2296_v31 = vld [vmem:[#allocation2 + $0x200] ss:$16 sps:$4 sm:$0xff]   ;;  %v2358_v15 = vld [vmem:[#allocation2 + $0xe8] ss:$16 sps:$4 sm:$0xff]  }
  0x1e   :  { %1315 = vmatprep.subr.bf16.mxu1 %v2275_v17  ;;  %v2297_v32 = vld [vmem:[#allocation2 + $0x1e4] ss:$16 sps:$4 sm:$0xff]   ;;  %v2301_v34 = vld [vmem:[#allocation2 + $0x1e0] ss:$16 sps:$4 sm:$0xff]   ;;  %v2686_v17 = vld [vmem:[%s2819_s0 + $0x18] ss:$0 sps:$4 sm:$0xff]  }
  0x1f   :  { %v2299_v33 = vld [vmem:[#allocation2 + $0x3e4] ss:$16 sps:$4 sm:$0xff]   ;;  %v2302_v35 = vld [vmem:[#allocation2 + $0x3e0] ss:$16 sps:$4 sm:$0xff]  }
  0x20   :  { %1275 = vmatpush1.bf16.msra.mxu0 %v2277_v18  ;;  %v2303_v36 = vld [vmem:[#allocation2 + $0x1c4] ss:$16 sps:$4 sm:$0xff]   ;;  %v2307_v38 = vld [vmem:[#allocation2 + $0x1c0] ss:$16 sps:$4 sm:$0xff]   ;;  %v2367_v18 = vld [vmem:[#allocation2 + $0xcc] ss:$16 sps:$4 sm:$0xff]  }
  0x21   :  { %1316 = vmatpush1.bf16.msra.mxu1 %v2278_v19  ;;  %1276 = vmatprep.subr.bf16.mxu0 %v2279_v20  ;;  %v2305_v37 = vld [vmem:[#allocation2 + $0x3c4] ss:$16 sps:$4 sm:$0xff]   ;;  %v2308_v39 = vld [vmem:[#allocation2 + $0x3c0] ss:$16 sps:$4 sm:$0xff]   ;;  %v2365_v20 = vld [vmem:[#allocation2 + $0xc8] ss:$16 sps:$4 sm:$0xff]  }
  0x22   :  { %1317 = vmatprep.subr.bf16.mxu1 %v2281_v21  ;;  %v2309_v40 = vld [vmem:[#allocation2 + $0x1a4] ss:$16 sps:$4 sm:$0xff]   ;;  %v2313_v42 = vld [vmem:[#allocation2 + $0x1a0] ss:$16 sps:$4 sm:$0xff]  }
  0x23   :  { %v2311_v41 = vld [vmem:[#allocation2 + $0x3a4] ss:$16 sps:$4 sm:$0xff]   ;;  %v2314_v43 = vld [vmem:[#allocation2 + $0x3a0] ss:$16 sps:$4 sm:$0xff]  }
  0x24   :  { %1277 = vmatpush1.bf16.msra.mxu0 %v2283_v22  ;;  %v2315_v44 = vld [vmem:[#allocation2 + $0x184] ss:$16 sps:$4 sm:$0xff]   ;;  %v2319_v49 = vld [vmem:[#allocation2 + $0x180] ss:$16 sps:$4 sm:$0xff]   ;;  %v2373_v22 = vld [vmem:[#allocation2 + $0xac] ss:$16 sps:$4 sm:$0xff]  }
  0x25   :  { %1318 = vmatpush1.bf16.msra.mxu1 %v2284_v23  ;;  %1278 = vmatprep.subr.bf16.mxu0 %v2285_v24  ;;  %v2317_v45 = vld [vmem:[#allocation2 + $0x384] ss:$16 sps:$4 sm:$0xff]   ;;  %v2320_v50 = vld [vmem:[#allocation2 + $0x380] ss:$16 sps:$4 sm:$0xff]   ;;  %v2371_v24 = vld [vmem:[#allocation2 + $0xa8] ss:$16 sps:$4 sm:$0xff]  }
  0x26   :  { %1319 = vmatprep.subr.bf16.mxu1 %v2287_v25  ;;  %v36_v46 = vld [vmem:[%s2819_s0] sm:$0xff] }
  0x27   :  { %v2667_v47 = vcombine.high %v36_v46, %v36_v46  ;;  %v2321_v52 = vld [vmem:[#allocation2 + $0x164] ss:$16 sps:$4 sm:$0xff]   ;;  %v2325_v54 = vld [vmem:[#allocation2 + $0x160] ss:$16 sps:$4 sm:$0xff]   ;;  %v2676_v6 = vcombine.low %v36_v46, %v36_v46  ;;  %v2401_v46 = vld [vmem:[#allocation2 + $0x8] ss:$16 sps:$4 sm:$0xff]  }
  0x28   :  { %1279 = vmatpush1.bf16.msra.mxu0 %v2289_v26  ;;  %v2323_v53 = vld [vmem:[#allocation2 + $0x364] ss:$16 sps:$4 sm:$0xff]   ;;  %v2326_v55 = vld [vmem:[#allocation2 + $0x360] ss:$16 sps:$4 sm:$0xff]   ;;  %v2379_v26 = vld [vmem:[#allocation2 + $0x8c] ss:$16 sps:$4 sm:$0xff]  }
  0x29   :  { %1320 = vmatpush1.bf16.msra.mxu1 %v2290_v27  ;;  %1280 = vmatprep.subr.bf16.mxu0 %v2291_v28  ;;  %v2327_v56 = vld [vmem:[#allocation2 + $0x144] ss:$16 sps:$4 sm:$0xff]   ;;  %v2331_v58 = vld [vmem:[#allocation2 + $0x140] ss:$16 sps:$4 sm:$0xff]   ;;  %v2377_v28 = vld [vmem:[#allocation2 + $0x88] ss:$16 sps:$4 sm:$0xff]  }
  0x2a   :  { %1321 = vmatprep.subr.bf16.mxu1 %v2293_v29  ;;  %1298 = vmatprep.mubr.bf16.mxu0 %v2667_v47  ;;  %v2329_v57 = vld [vmem:[#allocation2 + $0x344] ss:$16 sps:$4 sm:$0xff]   ;;  %v2332_v59 = vld [vmem:[#allocation2 + $0x340] ss:$16 sps:$4 sm:$0xff]  }
  0x2b   :  { %v2333_v60 = vld [vmem:[#allocation2 + $0x124] ss:$16 sps:$4 sm:$0xff]   ;;  %v2337_v62 = vld [vmem:[#allocation2 + $0x120] ss:$16 sps:$4 sm:$0xff]  }
  0x2c   :  { %1281 = vmatpush1.bf16.msra.mxu0 %v2295_v30  ;;  %v2335_v61 = vld [vmem:[#allocation2 + $0x324] ss:$16 sps:$4 sm:$0xff]   ;;  %v2338_v63 = vld [vmem:[#allocation2 + $0x320] ss:$16 sps:$4 sm:$0xff]   ;;  %v2385_v30 = vld [vmem:[#allocation2 + $0x6c] ss:$16 sps:$4 sm:$0xff]  }
  0x2d   :  { %1322 = vmatpush1.bf16.msra.mxu1 %v2296_v31  ;;  %1282 = vmatprep.subr.bf16.mxu0 %v2297_v32  ;;  %v2339_v0 = vld [vmem:[#allocation2 + $0x104] ss:$16 sps:$4 sm:$0xff]   ;;  %v2343_v2 = vld [vmem:[#allocation2 + $0x100] ss:$16 sps:$4 sm:$0xff]  }
  0x2e   :  { %1323 = vmatprep.subr.bf16.mxu1 %v2299_v33  ;;  %v2341_v1 = vld [vmem:[#allocation2 + $0x304] ss:$16 sps:$4 sm:$0xff]   ;;  %v2344_v3 = vld [vmem:[#allocation2 + $0x300] ss:$16 sps:$4 sm:$0xff]  }
  0x2f   :  { %v2351_v4 = vld [vmem:[#allocation2 + $0x4e4] ss:$16 sps:$4 sm:$0xff]   ;;  %v2349_v8 = vld [vmem:[#allocation2 + $0x4e0] ss:$16 sps:$4 sm:$0xff]  }
  0x30   :  { %1283 = vmatpush2.bf16.msra.mxu0 %v2301_v34  ;;  %v2354_v5 = vld [vmem:[#allocation2 + $0x604] ss:$16 sps:$4 sm:$0xff]   ;;  %v2352_v9 = vld [vmem:[#allocation2 + $0x600] ss:$16 sps:$4 sm:$0xff]   ;;  %v2383_v34 = vld [vmem:[#allocation2 + $0x68] ss:$16 sps:$4 sm:$0xff]  }
  0x31   :  { %1324 = vmatpush2.bf16.msra.mxu1 %v2302_v35  ;;  %1284 = vmatprep.subr.bf16.mxu0 %v2303_v36  ;;  %v2357_v10 = vld [vmem:[#allocation2 + $0x4c4] ss:$16 sps:$4 sm:$0xff]   ;;  %v2355_v12 = vld [vmem:[#allocation2 + $0x4c0] ss:$16 sps:$4 sm:$0xff]   ;;  %v2391_v36 = vld [vmem:[#allocation2 + $0x4c] ss:$16 sps:$4 sm:$0xff]  }
  0x32   :  { %1325 = vmatprep.subr.bf16.mxu1 %v2305_v37  ;;  %v2363_v14 = vld [vmem:[#allocation2 + $0x4a4] ss:$16 sps:$4 sm:$0xff]   ;;  %v2361_v16 = vld [vmem:[#allocation2 + $0x4a0] ss:$16 sps:$4 sm:$0xff]  }
  0x33   :  { %v2370_v19 = vld [vmem:[#allocation2 + $0x484] ss:$16 sps:$4 sm:$0xff]   ;;  %v2368_v21 = vld [vmem:[#allocation2 + $0x480] ss:$16 sps:$4 sm:$0xff]  }
  0x34   :  { %1285 = vmatpush2.bf16.msra.mxu0 %v2307_v38  ;;  %v2376_v23 = vld [vmem:[#allocation2 + $0x464] ss:$16 sps:$4 sm:$0xff]   ;;  %v2374_v25 = vld [vmem:[#allocation2 + $0x460] ss:$16 sps:$4 sm:$0xff]   ;;  %v2389_v38 = vld [vmem:[#allocation2 + $0x48] ss:$16 sps:$4 sm:$0xff]  }
  0x35   :  { %1326 = vmatpush2.bf16.msra.mxu1 %v2308_v39  ;;  %1286 = vmatprep.subr.bf16.mxu0 %v2309_v40  ;;  %v2382_v27 = vld [vmem:[#allocation2 + $0x444] ss:$16 sps:$4 sm:$0xff]   ;;  %v2380_v29 = vld [vmem:[#allocation2 + $0x440] ss:$16 sps:$4 sm:$0xff]   ;;  %v2397_v40 = vld [vmem:[#allocation2 + $0x2c] ss:$16 sps:$4 sm:$0xff]  }
  0x36   :  { %1327 = vmatprep.subr.bf16.mxu1 %v2311_v41  ;;  %v2388_v31 = vld [vmem:[#allocation2 + $0x424] ss:$16 sps:$4 sm:$0xff]   ;;  %v2386_v35 = vld [vmem:[#allocation2 + $0x420] ss:$16 sps:$4 sm:$0xff]  }
  0x37   :  { %v2694_v32 = vld [vmem:[%s2819_s0 + $0x10] sm:$0xff] }
  0x38   :  { %1287 = vmatpush2.bf16.msra.mxu0 %v2313_v42  ;;  %v2698_v33 = vcombine.high %v2694_v32, %v2694_v32  ;;  %v2394_v37 = vld [vmem:[#allocation2 + $0x404] ss:$16 sps:$4 sm:$0xff]   ;;  %v2392_v39 = vld [vmem:[#allocation2 + $0x400] ss:$16 sps:$4 sm:$0xff]   ;;  %v2395_v42 = vld [vmem:[#allocation2 + $0x28] ss:$16 sps:$4 sm:$0xff]  }
  0x39   :  { %1328 = vmatpush2.bf16.msra.mxu1 %v2314_v43  ;;  %1288 = vmatprep.subr.bf16.mxu0 %v2315_v44  ;;  %v2400_v41 = vld [vmem:[#allocation2 + $0x5e4] ss:$16 sps:$4 sm:$0xff]   ;;  %v2398_v43 = vld [vmem:[#allocation2 + $0x5e0] ss:$16 sps:$4 sm:$0xff]   ;;  %v2403_v44 = vld [vmem:[#allocation2 + $0xc] ss:$16 sps:$4 sm:$0xff]  }
  0x3a   :  { %1329 = vmatprep.subr.bf16.mxu1 %v2317_v45  ;;  %v2406_v45 = vld [vmem:[#allocation2 + $0x5c4] ss:$16 sps:$4 sm:$0xff]  }
  0x3c   :  { %1289 = vmatpush2.bf16.msra.mxu0 %v2319_v49  ;;  %v2412_v49 = vld [vmem:[#allocation2 + $0x5a4] ss:$16 sps:$4 sm:$0xff]  }
  0x3d   :  { %1330 = vmatpush2.bf16.msra.mxu1 %v2320_v50  ;;  %1290 = vmatprep.subr.bf16.mxu0 %v2321_v52  ;;  %v2407_v50 = vld [vmem:[#allocation2 + $0x1e8] ss:$16 sps:$4 sm:$0xff]   ;;  %v2410_v52 = vld [vmem:[#allocation2 + $0x5a0] ss:$16 sps:$4 sm:$0xff]  }
  0x3e   :  { %1331 = vmatprep.subr.bf16.mxu1 %v2323_v53  ;;  %v2415_v53 = vld [vmem:[#allocation2 + $0x1cc] ss:$16 sps:$4 sm:$0xff]  }
  0x40   :  { %1291 = vmatpush2.bf16.msra.mxu0 %v2325_v54  ;;  %v2418_v54 = vld [vmem:[#allocation2 + $0x584] ss:$16 sps:$4 sm:$0xff]  }
  0x41   :  { %1332 = vmatpush2.bf16.msra.mxu1 %v2326_v55  ;;  %1292 = vmatprep.subr.bf16.mxu0 %v2327_v56  ;;  %v2413_v55 = vld [vmem:[#allocation2 + $0x1c8] ss:$16 sps:$4 sm:$0xff]   ;;  %v2416_v56 = vld [vmem:[#allocation2 + $0x580] ss:$16 sps:$4 sm:$0xff]  }
  0x42   :  { %1333 = vmatprep.subr.bf16.mxu1 %v2329_v57  ;;  %v2421_v57 = vld [vmem:[#allocation2 + $0x1ac] ss:$16 sps:$4 sm:$0xff]  }
  0x44   :  { %1293 = vmatpush2.bf16.msra.mxu0 %v2331_v58  ;;  %v2424_v58 = vld [vmem:[#allocation2 + $0x564] ss:$16 sps:$4 sm:$0xff]  }
  0x45   :  { %1334 = vmatpush2.bf16.msra.mxu1 %v2332_v59  ;;  %1294 = vmatprep.subr.bf16.mxu0 %v2333_v60  ;;  %v2419_v59 = vld [vmem:[#allocation2 + $0x1a8] ss:$16 sps:$4 sm:$0xff]   ;;  %v2422_v60 = vld [vmem:[#allocation2 + $0x560] ss:$16 sps:$4 sm:$0xff]  }
  0x46   :  { %1335 = vmatprep.subr.bf16.mxu1 %v2335_v61  ;;  %v2427_v61 = vld [vmem:[#allocation2 + $0x18c] ss:$16 sps:$4 sm:$0xff]  }
  0x48   :  { %1295 = vmatpush2.bf16.msra.mxu0 %v2337_v62  ;;  %v2430_v62 = vld [vmem:[#allocation2 + $0x544] ss:$16 sps:$4 sm:$0xff]  }
  0x49   :  { %1336 = vmatpush2.bf16.msra.mxu1 %v2338_v63  ;;  %1296 = vmatprep.subr.bf16.mxu0 %v2339_v0  ;;  %v2425_v63 = vld [vmem:[#allocation2 + $0x188] ss:$16 sps:$4 sm:$0xff]   ;;  %v2428_v0 = vld [vmem:[#allocation2 + $0x540] ss:$16 sps:$4 sm:$0xff]  }
  0x4a   :  { %1337 = vmatprep.subr.bf16.mxu1 %v2341_v1  ;;  %v2433_v1 = vld [vmem:[#allocation2 + $0x16c] ss:$16 sps:$4 sm:$0xff]  }
  0x4c   :  { %1297 = vmatpush2.bf16.msra.mxu0 %v2343_v2  ;;  %v2436_v2 = vld [vmem:[#allocation2 + $0x524] ss:$16 sps:$4 sm:$0xff]  }
  0x4d   :  { %1338 = vmatpush2.bf16.msra.mxu1 %v2344_v3  ;;  %1348 = vmatprep.subr.bf16.mxu0 %v2351_v4  ;;  %v2431_v3 = vld [vmem:[#allocation2 + $0x168] ss:$16 sps:$4 sm:$0xff]   ;;  %v2434_v4 = vld [vmem:[#allocation2 + $0x520] ss:$16 sps:$4 sm:$0xff]  }
  0x4e   :  { %1403 = vmatprep.subr.bf16.mxu1 %v2354_v5  ;;  %v2439_v5 = vld [vmem:[#allocation2 + $0x14c] ss:$16 sps:$4 sm:$0xff]  }
  0x4f   :  { %1299 = vmatmul.mubr.bf16.vlgmr.msra.gmra.mxu0 %v2676_v6 }
  0x50   :  { %1340 = vmatmul.mubr.bf16.vlgmr.msra.gmra.mxu1 %v2678_v7  ;;  %1349 = vmatpush1.bf16.msra.mxu0 %v2349_v8  ;;  %v2442_v8 = vld [vmem:[#allocation2 + $0x504] ss:$16 sps:$4 sm:$0xff]  }
  0x51   :  { %1404 = vmatpush1.bf16.msra.mxu1 %v2352_v9  ;;  %1350 = vmatprep.subr.bf16.mxu0 %v2357_v10  ;;  %v2437_v9 = vld [vmem:[#allocation2 + $0x148] ss:$16 sps:$4 sm:$0xff]   ;;  %v2440_v10 = vld [vmem:[#allocation2 + $0x500] ss:$16 sps:$4 sm:$0xff]  }
  0x52   :  { %1421 = vmatprep.mubr.bf16.mxu1 %v2629_v13  ;;  %1430 = vmatprep.subr.bf16.mxu1 %v2360_v11  ;;  %v2447_v11 = vld [vmem:[#allocation2 + $0x12c] ss:$16 sps:$4 sm:$0xff]  }
  0x53   :  { %1380 = vmatprep.mubr.bf16.mxu0 %v2698_v33 }
  0x54   :  { %1351 = vmatpush1.bf16.msra.mxu0 %v2355_v12  ;;  %v2450_v12 = vld [vmem:[#allocation2 + $0x2ec] ss:$16 sps:$4 sm:$0xff]  }
  0x55   :  { %1352 = vmatprep.subr.bf16.mxu0 %v2363_v14  ;;  %v2703_v14 = vcombine.low %v2694_v32, %v2694_v32  ;;  %v2469_v32 = vld [vmem:[#allocation2 + $0x4a8] ss:$16 sps:$4 sm:$0xff]  }
  0x58   :  { %2165 = vmatmul.mubr.msk.bf16.vlgmr.msra.gmra.mxu1 %vm1262_vm0, %v2686_v17  ;;  %1353 = vmatpush1.bf16.msra.mxu0 %v2361_v16  ;;  %v2448_v16 = vld [vmem:[#allocation2 + $0x2e8] ss:$16 sps:$4 sm:$0xff]  }
  0x59   :  { %1431 = vmatpush1.bf16.msra.mxu1 %v2358_v15  ;;  %1354 = vmatprep.subr.bf16.mxu0 %v2370_v19  ;;  %v2445_v15 = vld [vmem:[#allocation2 + $0x128] ss:$16 sps:$4 sm:$0xff]   ;;  %v2456_v19 = vld [vmem:[#allocation2 + $0x2cc] ss:$16 sps:$4 sm:$0xff]  }
  0x5a   :  { %1432 = vmatprep.subr.bf16.mxu1 %v2367_v18  ;;  %1462 = vmatprep.mubr.bf16.mxu1 %v2667_v47  ;;  %v2404_v47 = vld [vmem:[#allocation2 + $0x5c0] ss:$16 sps:$4 sm:$0xff]   ;;  %v2453_v18 = vld [vmem:[#allocation2 + $0x10c] ss:$16 sps:$4 sm:$0xff]  }
  0x5c   :  { %1355 = vmatpush1.bf16.msra.mxu0 %v2368_v21  ;;  %v2454_v21 = vld [vmem:[#allocation2 + $0x2c8] ss:$16 sps:$4 sm:$0xff]  }
  0x5d   :  { %1433 = vmatpush1.bf16.msra.mxu1 %v2365_v20  ;;  %1356 = vmatprep.subr.bf16.mxu0 %v2376_v23  ;;  %v2451_v20 = vld [vmem:[#allocation2 + $0x108] ss:$16 sps:$4 sm:$0xff]   ;;  %v2462_v23 = vld [vmem:[#allocation2 + $0x2ac] ss:$16 sps:$4 sm:$0xff]  }
  0x5e   :  { %1434 = vmatprep.subr.bf16.mxu1 %v2373_v22  ;;  %v2459_v22 = vld [vmem:[#allocation2 + $0x4ec] ss:$16 sps:$4 sm:$0xff]  }
  0x60   :  { %1357 = vmatpush1.bf16.msra.mxu0 %v2374_v25  ;;  %v2460_v25 = vld [vmem:[#allocation2 + $0x2a8] ss:$16 sps:$4 sm:$0xff]  }
  0x61   :  { %1435 = vmatpush1.bf16.msra.mxu1 %v2371_v24  ;;  %1358 = vmatprep.subr.bf16.mxu0 %v2382_v27  ;;  %v2457_v24 = vld [vmem:[#allocation2 + $0x4e8] ss:$16 sps:$4 sm:$0xff]   ;;  %v2468_v27 = vld [vmem:[#allocation2 + $0x28c] ss:$16 sps:$4 sm:$0xff]  }
  0x62   :  { %1436 = vmatprep.subr.bf16.mxu1 %v2379_v26  ;;  %v2465_v26 = vld [vmem:[#allocation2 + $0x4cc] ss:$16 sps:$4 sm:$0xff]  }
  0x64   :  { %1359 = vmatpush1.bf16.msra.mxu0 %v2380_v29  ;;  %v2466_v29 = vld [vmem:[#allocation2 + $0x288] ss:$16 sps:$4 sm:$0xff]  }
  0x65   :  { %1437 = vmatpush1.bf16.msra.mxu1 %v2377_v28  ;;  %1360 = vmatprep.subr.bf16.mxu0 %v2388_v31  ;;  %v2463_v28 = vld [vmem:[#allocation2 + $0x4c8] ss:$16 sps:$4 sm:$0xff]   ;;  %v2474_v31 = vld [vmem:[#allocation2 + $0x26c] ss:$16 sps:$4 sm:$0xff]  }
  0x66   :  { %1438 = vmatprep.subr.bf16.mxu1 %v2385_v30  ;;  %v2471_v30 = vld [vmem:[#allocation2 + $0x4ac] ss:$16 sps:$4 sm:$0xff]  }
  0x68   :  { %1361 = vmatpush1.bf16.msra.mxu0 %v2386_v35  ;;  %v2480_v35 = vld [vmem:[#allocation2 + $0x24c] ss:$16 sps:$4 sm:$0xff]  }
  0x69   :  { %1439 = vmatpush1.bf16.msra.mxu1 %v2383_v34  ;;  %1362 = vmatprep.subr.bf16.mxu0 %v2394_v37  ;;  %v2472_v34 = vld [vmem:[#allocation2 + $0x268] ss:$16 sps:$4 sm:$0xff]  }
  0x6a   :  { %1440 = vmatprep.subr.bf16.mxu1 %v2391_v36  ;;  %v2475_v36 = vld [vmem:[#allocation2 + $0x488] ss:$16 sps:$4 sm:$0xff]  }
  0x6b   :  { %v2478_v37 = vld [vmem:[#allocation2 + $0x248] ss:$16 sps:$4 sm:$0xff]  }
  0x6c   :  { %1363 = vmatpush1.bf16.msra.mxu0 %v2392_v39  ;;  %v2481_v39 = vld [vmem:[#allocation2 + $0x468] ss:$16 sps:$4 sm:$0xff]  }
  0x6d   :  { %1441 = vmatpush1.bf16.msra.mxu1 %v2389_v38  ;;  %1364 = vmatprep.subr.bf16.mxu0 %v2400_v41  ;;  %v2483_v38 = vld [vmem:[#allocation2 + $0x46c] ss:$16 sps:$4 sm:$0xff]  }
  0x6e   :  { %1442 = vmatprep.subr.bf16.mxu1 %v2397_v40  ;;  %v2484_v40 = vld [vmem:[#allocation2 + $0x228] ss:$16 sps:$4 sm:$0xff]   ;;  %v2489_v41 = vld [vmem:[#allocation2 + $0x44c] ss:$16 sps:$4 sm:$0xff]  }
  0x70   :  { %1365 = vmatpush2.bf16.msra.mxu0 %v2398_v43  ;;  %v2490_v43 = vld [vmem:[#allocation2 + $0x208] ss:$16 sps:$4 sm:$0xff]  }
  0x71   :  { %1443 = vmatpush1.bf16.msra.mxu1 %v2395_v42  ;;  %1366 = vmatprep.subr.bf16.mxu0 %v2406_v45  ;;  %v2492_v42 = vld [vmem:[#allocation2 + $0x20c] ss:$16 sps:$4 sm:$0xff]  }
  0x72   :  { %1444 = vmatprep.subr.bf16.mxu1 %v2403_v44  ;;  %v2495_v44 = vld [vmem:[#allocation2 + $0x42c] ss:$16 sps:$4 sm:$0xff]  }
  0x73   :  { %v2498_v45 = vld [vmem:[#allocation2 + $0x3ec] ss:$16 sps:$4 sm:$0xff]  }
  0x74   :  { %1367 = vmatpush2.bf16.msra.mxu0 %v2404_v47  ;;  %v2496_v47 = vld [vmem:[#allocation2 + $0x3e8] ss:$16 sps:$4 sm:$0xff]  }
  0x75   :  { %1445 = vmatpush1.bf16.msra.mxu1 %v2401_v46  ;;  %1368 = vmatprep.subr.bf16.mxu0 %v2412_v49  ;;  %v2493_v46 = vld [vmem:[#allocation2 + $0x428] ss:$16 sps:$4 sm:$0xff]   ;;  %v2504_v49 = vld [vmem:[#allocation2 + $0x3cc] ss:$16 sps:$4 sm:$0xff]  }
  0x76   :  { %1446 = vmatprep.subr.bf16.mxu1 %v2409_v48  ;;  %v2501_v48 = vld [vmem:[#allocation2 + $0x40c] ss:$16 sps:$4 sm:$0xff]  }
  0x78   :  { %1369 = vmatpush2.bf16.msra.mxu0 %v2410_v52  ;;  %v2502_v52 = vld [vmem:[#allocation2 + $0x3c8] ss:$16 sps:$4 sm:$0xff]  }
  0x79   :  { %1447 = vmatpush2.bf16.msra.mxu1 %v2407_v50  ;;  %1370 = vmatprep.subr.bf16.mxu0 %v2418_v54  ;;  %v2499_v50 = vld [vmem:[#allocation2 + $0x408] ss:$16 sps:$4 sm:$0xff]   ;;  %v2510_v54 = vld [vmem:[#allocation2 + $0x3ac] ss:$16 sps:$4 sm:$0xff]  }
  0x7a   :  { %1448 = vmatprep.subr.bf16.mxu1 %v2415_v53  ;;  %v2507_v53 = vld [vmem:[#allocation2 + $0x5ec] ss:$16 sps:$4 sm:$0xff]  }
  0x7c   :  { %1371 = vmatpush2.bf16.msra.mxu0 %v2416_v56  ;;  %v2508_v56 = vld [vmem:[#allocation2 + $0x3a8] ss:$16 sps:$4 sm:$0xff]  }
  0x7d   :  { %1449 = vmatpush2.bf16.msra.mxu1 %v2413_v55  ;;  %1372 = vmatprep.subr.bf16.mxu0 %v2424_v58  ;;  %v2505_v55 = vld [vmem:[#allocation2 + $0x5e8] ss:$16 sps:$4 sm:$0xff]   ;;  %v2516_v58 = vld [vmem:[#allocation2 + $0x38c] ss:$16 sps:$4 sm:$0xff]  }
  0x7e   :  { %1450 = vmatprep.subr.bf16.mxu1 %v2421_v57  ;;  %v2513_v57 = vld [vmem:[#allocation2 + $0x5cc] ss:$16 sps:$4 sm:$0xff]  }
  0x80   :  { %1373 = vmatpush2.bf16.msra.mxu0 %v2422_v60  ;;  %v2514_v60 = vld [vmem:[#allocation2 + $0x388] ss:$16 sps:$4 sm:$0xff]  }
  0x81   :  { %1451 = vmatpush2.bf16.msra.mxu1 %v2419_v59  ;;  %1374 = vmatprep.subr.bf16.mxu0 %v2430_v62  ;;  %v2511_v59 = vld [vmem:[#allocation2 + $0x5c8] ss:$16 sps:$4 sm:$0xff]   ;;  %v2522_v62 = vld [vmem:[#allocation2 + $0x36c] ss:$16 sps:$4 sm:$0xff]  }
  0x82   :  { %1452 = vmatprep.subr.bf16.mxu1 %v2427_v61  ;;  %v2519_v61 = vld [vmem:[#allocation2 + $0x5ac] ss:$16 sps:$4 sm:$0xff]  }
  0x84   :  { %1375 = vmatpush2.bf16.msra.mxu0 %v2428_v0  ;;  %v2520_v0 = vld [vmem:[#allocation2 + $0x368] ss:$16 sps:$4 sm:$0xff]  }
  0x85   :  { %1453 = vmatpush2.bf16.msra.mxu1 %v2425_v63  ;;  %1376 = vmatprep.subr.bf16.mxu0 %v2436_v2  ;;  %v2517_v63 = vld [vmem:[#allocation2 + $0x5a8] ss:$16 sps:$4 sm:$0xff]   ;;  %v2528_v2 = vld [vmem:[#allocation2 + $0x34c] ss:$16 sps:$4 sm:$0xff]  }
  0x86   :  { %1454 = vmatprep.subr.bf16.mxu1 %v2433_v1  ;;  %v2525_v1 = vld [vmem:[#allocation2 + $0x58c] ss:$16 sps:$4 sm:$0xff]  }
  0x88   :  { %1377 = vmatpush2.bf16.msra.mxu0 %v2434_v4  ;;  %v2526_v4 = vld [vmem:[#allocation2 + $0x348] ss:$16 sps:$4 sm:$0xff]  }
  0x89   :  { %1455 = vmatpush2.bf16.msra.mxu1 %v2431_v3  ;;  %1378 = vmatprep.subr.bf16.mxu0 %v2442_v8  ;;  %v2523_v3 = vld [vmem:[#allocation2 + $0x588] ss:$16 sps:$4 sm:$0xff]   ;;  %v2534_v8 = vld [vmem:[#allocation2 + $0x32c] ss:$16 sps:$4 sm:$0xff]  }
  0x8a   :  { %1456 = vmatprep.subr.bf16.mxu1 %v2439_v5  ;;  %v2531_v5 = vld [vmem:[#allocation2 + $0x56c] ss:$16 sps:$4 sm:$0xff]  }
  0x8c   :  { %1379 = vmatpush2.bf16.msra.mxu0 %v2440_v10  ;;  %v2532_v10 = vld [vmem:[#allocation2 + $0x328] ss:$16 sps:$4 sm:$0xff]  }
  0x8d   :  { %1457 = vmatpush2.bf16.msra.mxu1 %v2437_v9  ;;  %1471 = vmatprep.subr.bf16.mxu0 %v2450_v12  ;;  %v2529_v9 = vld [vmem:[#allocation2 + $0x568] ss:$16 sps:$4 sm:$0xff]   ;;  %v2540_v12 = vld [vmem:[#allocation2 + $0x30c] ss:$16 sps:$4 sm:$0xff]  }
  0x8e   :  { %1458 = vmatprep.subr.bf16.mxu1 %v2447_v11  ;;  %v2537_v11 = vld [vmem:[#allocation2 + $0x54c] ss:$16 sps:$4 sm:$0xff]  }
  0x8f   :  { %1381 = vmatmul.mubr.bf16.vlgmr.msra.gmra.mxu0 %v2703_v14 }
  0x90   :  { %1472 = vmatpush1.bf16.msra.mxu0 %v2448_v16  ;;  %1503 = vmatprep.mubr.bf16.mxu0 %v2672_v51  ;;  %v2477_v51 = vld [vmem:[#allocation2 + $0x48c] ss:$16 sps:$4 sm:$0xff]   ;;  %v2538_v16 = vld [vmem:[#allocation2 + $0x308] ss:$16 sps:$4 sm:$0xff]  }
  0x91   :  { %1459 = vmatpush2.bf16.msra.mxu1 %v2445_v15  ;;  %1473 = vmatprep.subr.bf16.mxu0 %v2456_v19  ;;  %v2535_v15 = vld [vmem:[#allocation2 + $0x548] ss:$16 sps:$4 sm:$0xff]   ;;  %v2546_v19 = vld [vmem:[#allocation2 + $0x60c] ss:$16 sps:$4 sm:$0xff]  }
  0x92   :  { %1460 = vmatprep.subr.bf16.mxu1 %v2453_v18  ;;  %v2543_v18 = vld [vmem:[#allocation2 + $0x52c] ss:$16 sps:$4 sm:$0xff]  }
  0x94   :  { %1474 = vmatpush1.bf16.msra.mxu0 %v2454_v21  ;;  %v2544_v21 = vld [vmem:[#allocation2 + $0x608] ss:$16 sps:$4 sm:$0xff]  }
  0x95   :  { %1461 = vmatpush2.bf16.msra.mxu1 %v2451_v20  ;;  %1475 = vmatprep.subr.bf16.mxu0 %v2462_v23  ;;  %v2541_v20 = vld [vmem:[#allocation2 + $0x528] ss:$16 sps:$4 sm:$0xff]  }
  0x96   :  { %1512 = vmatprep.subr.bf16.mxu1 %v2459_v22  ;;  %v2549_v22 = vld [vmem:[#allocation2 + $0x50c] ss:$16 sps:$4 sm:$0xff]  }
  0x97   :  { %v2550_v23 = vld [vmem:[%s2822_s3 + $0x78] sm:$0xff]  }
  0x98   :  { %1463 = vmatmul.mubr.bf16.vlgmr.msra.gmra.mxu1 %v2676_v6  ;;  %1476 = vmatpush1.bf16.msra.mxu0 %v2460_v25  ;;  %v2486_v6 = vld [vmem:[#allocation2 + $0x22c] ss:$16 sps:$4 sm:$0xff]  }
  0x99   :  { %1513 = vmatpush1.bf16.msra.mxu1 %v2457_v24  ;;  %1477 = vmatprep.subr.bf16.mxu0 %v2468_v27  ;;  %v2547_v24 = vld [vmem:[#allocation2 + $0x508] ss:$16 sps:$4 sm:$0xff]  }
  0x9a   :  { %1514 = vmatprep.subr.bf16.mxu1 %v2465_v26  ;;  %1544 = vmatprep.mubr.bf16.mxu1 %v2698_v33  ;;  %v2487_v33 = vld [vmem:[#allocation2 + $0x448] ss:$16 sps:$4 sm:$0xff]   ;;  %v2552_v26 = vld [vmem:[%s2822_s3 + $0x70] sm:$0xff]  }
  0x9b   :  { %v2551_v25 = vld [vmem:[%s2822_s3 + $0x38] sm:$0xff]   ;;  %v2555_v27 = vld [vmem:[%s2822_s3 + $0x28] sm:$0xff]  }
  0x9c   :  { %1478 = vmatpush1.bf16.msra.mxu0 %v2466_v29  ;;  %v2568_v29 = vld [vmem:[%s2822_s3 + $0xf0] sm:$0xff]  }
  0x9d   :  { %1515 = vmatpush1.bf16.msra.mxu1 %v2463_v28  ;;  %1479 = vmatprep.subr.bf16.mxu0 %v2474_v31  ;;  %v2567_v28 = vld [vmem:[%s2822_s3 + $0xb8] sm:$0xff]   ;;  %v2569_v31 = vld [vmem:[%s2822_s3 + $0xb0] sm:$0xff]  }
  0x9e   :  { %1516 = vmatprep.subr.bf16.mxu1 %v2471_v30  ;;  %v2557_v30 = vld [vmem:[%s2822_s3 + $0x20] sm:$0xff]  }
  0xa0   :  { %1480 = vmatpush1.bf16.msra.mxu0 %v2472_v34  ;;  %v2570_v34 = vld [vmem:[%s2822_s3 + $0xe8] sm:$0xff]  }
  0xa1   :  { %1517 = vmatpush1.bf16.msra.mxu1 %v2469_v32  ;;  %1481 = vmatprep.subr.bf16.mxu0 %v2480_v35  ;;  %v2558_v32 = vld [vmem:[%s2822_s3 + $0x58] sm:$0xff]   ;;  %v2571_v35 = vld [vmem:[%s2822_s3 + $0xa8] sm:$0xff]  }
  0xa2   :  { %1518 = vmatprep.subr.bf16.mxu1 %v2477_v51  ;;  %v2559_v51 = vld [vmem:[%s2822_s3 + $0x18] sm:$0xff]  }
  0xa4   :  { %1482 = vmatpush1.bf16.msra.mxu0 %v2478_v37  ;;  %v2572_v37 = vld [vmem:[%s2822_s3 + $0xe0] sm:$0xff]  }
  0xa5   :  { %1519 = vmatpush1.bf16.msra.mxu1 %v2475_v36  ;;  %1483 = vmatprep.subr.bf16.mxu0 %v2486_v6  ;;  %v2560_v36 = vld [vmem:[%s2822_s3 + $0x50] sm:$0xff]   ;;  %v2562_v6 = vld [vmem:[%s2822_s3 + $0x48] sm:$0xff]  }
  0xa6   :  { %1520 = vmatprep.subr.bf16.mxu1 %v2483_v38  ;;  %v2561_v38 = vld [vmem:[%s2822_s3 + $0x10] sm:$0xff]  }
  0xa8   :  { %1484 = vmatpush1.bf16.msra.mxu0 %v2484_v40  ;;  %v2564_v40 = vld [vmem:[%s2822_s3 + $0x40] sm:$0xff]  }
  0xa9   :  { %1521 = vmatpush1.bf16.msra.mxu1 %v2481_v39  ;;  %1485 = vmatprep.subr.bf16.mxu0 %v2492_v42  ;;  %v2563_v39 = vld [vmem:[%s2822_s3 + $0x8] sm:$0xff]   ;;  %v2573_v42 = vld [vmem:[%s2822_s3 + $0xa0] sm:$0xff]  }
  0xaa   :  { %1522 = vmatprep.subr.bf16.mxu1 %v2489_v41  ;;  %v2565_v41 = vld [vmem:[%s2822_s3] sm:$0xff]  }
  0xac   :  { %1486 = vmatpush1.bf16.msra.mxu0 %v2490_v43 }
  0xad   :  { %1523 = vmatpush1.bf16.msra.mxu1 %v2487_v33  ;;  %1487 = vmatprep.subr.bf16.mxu0 %v2498_v45 }
  0xae   :  { %1524 = vmatprep.subr.bf16.mxu1 %v2495_v44 }
  0xb0   :  { %1488 = vmatpush2.bf16.msra.mxu0 %v2496_v47  ;;  %v2575_v47 = vld [vmem:[%s2822_s3 + $0x98] sm:$0xff]  }
  0xb1   :  { %1525 = vmatpush1.bf16.msra.mxu1 %v2493_v46  ;;  %1489 = vmatprep.subr.bf16.mxu0 %v2504_v49  ;;  %v2574_v46 = vld [vmem:[%s2822_s3 + $0xd8] sm:$0xff]  }
  0xb2   :  { %1526 = vmatprep.subr.bf16.mxu1 %v2501_v48 }
  0xb4   :  { %1490 = vmatpush2.bf16.msra.mxu0 %v2502_v52 }
  0xb5   :  { %1527 = vmatpush1.bf16.msra.mxu1 %v2499_v50  ;;  %1491 = vmatprep.subr.bf16.mxu0 %v2510_v54  ;;  %v2577_v54 = vld [vmem:[%s2822_s3 + $0x90] sm:$0xff]  }
  0xb6   :  { %1528 = vmatprep.subr.bf16.mxu1 %v2507_v53  ;;  %v2576_v53 = vld [vmem:[%s2822_s3 + $0xd0] sm:$0xff]  }
  0xb8   :  { %1492 = vmatpush2.bf16.msra.mxu0 %v2508_v56 }
  0xb9   :  { %1529 = vmatpush2.bf16.msra.mxu1 %v2505_v55  ;;  %1493 = vmatprep.subr.bf16.mxu0 %v2516_v58  ;;  %v2579_v58 = vld [vmem:[%s2822_s3 + $0x88] sm:$0xff]  }
  0xba   :  { %1530 = vmatprep.subr.bf16.mxu1 %v2513_v57  ;;  %v2578_v57 = vld [vmem:[%s2822_s3 + $0xc8] sm:$0xff]  }
  0xbc   :  { %1494 = vmatpush2.bf16.msra.mxu0 %v2514_v60 }
  0xbd   :  { %1531 = vmatpush2.bf16.msra.mxu1 %v2511_v59  ;;  %1495 = vmatprep.subr.bf16.mxu0 %v2522_v62  ;;  %v2581_v62 = vld [vmem:[%s2822_s3 + $0x80] sm:$0xff]  }
  0xbe   :  { %1532 = vmatprep.subr.bf16.mxu1 %v2519_v61  ;;  %v2580_v61 = vld [vmem:[%s2822_s3 + $0xc0] sm:$0xff]  }
  0xc0   :  { %1496 = vmatpush2.bf16.msra.mxu0 %v2520_v0 }
  0xc1   :  { %1533 = vmatpush2.bf16.msra.mxu1 %v2517_v63  ;;  %1497 = vmatprep.subr.bf16.mxu0 %v2528_v2  ;;  %v238_v63 = vlaneseq  ;;  %v236_v2 = vld [vmem:[%s2821_s2] sm:$0xf] }
  0xc2   :  { %1534 = vmatprep.subr.bf16.mxu1 %v2525_v1 }
  0xc3   :  { %v239_v0 = vshrl.u32 %v238_v63, 7 }
  0xc4   :  { %1498 = vmatpush2.bf16.msra.mxu0 %v2526_v4 }
  0xc5   :  { %1535 = vmatpush2.bf16.msra.mxu1 %v2523_v3  ;;  %1499 = vmatprep.subr.bf16.mxu0 %v2534_v8  ;;  %v240_v1 = vsub.s32 0, %v239_v0  ;;  %v244_v3 = vsub.s32 1, %v239_v0 }
  0xc6   :  { %1536 = vmatprep.subr.bf16.mxu1 %v2531_v5 }
  0xc7   :  { %v241_v4 = vrot.slane %v236_v2, %v240_v1  ;;  %v245_v5 = vrot.slane %v236_v2, %v244_v3 }
  0xc8   :  { %1500 = vmatpush2.bf16.msra.mxu0 %v2532_v10 }
  0xc9   :  { %1537 = vmatpush2.bf16.msra.mxu1 %v2529_v9  ;;  %1501 = vmatprep.subr.bf16.mxu0 %v2540_v12 }
  0xca   :  { %1538 = vmatprep.subr.bf16.mxu1 %v2537_v11 }
  0xcc   :  { %1502 = vmatpush2.bf16.msra.mxu0 %v2538_v16 }
  0xcd   :  { %1539 = vmatpush2.bf16.msra.mxu1 %v2535_v15  ;;  %1567 = vmatprep.subr.bf16.mxu0 %v2546_v19 }
  0xce   :  { %1540 = vmatprep.subr.bf16.mxu1 %v2543_v18 }
  0xcf   :  { %1504 = vmatmul.mubr.bf16.vlgmr.msra.gmra.mxu0 %v2678_v7  ;;  %v2553_v7 = vld [vmem:[%s2822_s3 + $0x30] sm:$0xff]  }
  0xd0   :  { %1568 = vmatpush1.bf16.msra.mxu0 %v2544_v21  ;;  %1585 = vmatprep.mubr.bf16.mxu0 %v2629_v13  ;;  %v2554_v13 = vld [vmem:[%s2822_s3 + $0x68] sm:$0xff]  }
  0xd1   :  { %1541 = vmatpush2.bf16.msra.mxu1 %v2541_v20  ;;  %2200 = vmatprep.subr.bf16.mxu0 %v2550_v23 }
  0xd2   :  { %1542 = vmatprep.subr.bf16.mxu1 %v2549_v22 }
  0xd5   :  { %1543 = vmatpush2.bf16.msra.mxu1 %v2547_v24 }
  0xd7   :  { %2166 = vmatmul.mubr.msk.bf16.vlgmr.msra.gmra.mxu0 %vm1262_vm0, %v2686_v17  ;;  %v2566_v17 = vld [vmem:[%s2822_s3 + $0xf8] sm:$0xff]  }
  0xd8   :  { %1545 = vmatmul.mubr.bf16.vlgmr.msra.gmra.mxu1 %v2703_v14  ;;  %2201 = vmatpush3.bf16.msra.mxu0 %v2551_v25  ;;  %v2556_v14 = vld [vmem:[%s2822_s3 + $0x60] sm:$0xff]  }
  0xd9   :  { %2202 = vmatprep.subr.bf16.mxu0 %v2552_v26  ;;  %2222 = vmatprep.subr.bf16.mxu1 %v2566_v17  ;;  %v248_v17 = vsub.s32 2, %v239_v0 }
  0xda   :  { %2223 = vmatpush3.bf16.msra.mxu1 %v2567_v28  ;;  %v252_v28 = vsub.s32 3, %v239_v0 }
  0xdb   :  { %2224 = vmatprep.subr.bf16.mxu1 %v2568_v29 }
  0xdc   :  { %2203 = vmatpush3.bf16.msra.mxu0 %v2553_v7 }
  0xdd   :  { %2204 = vmatprep.subr.bf16.mxu0 %v2554_v13 }
  0xde   :  { %2225 = vmatpush3.bf16.msra.mxu1 %v2569_v31 }
  0xdf   :  { %2226 = vmatprep.subr.bf16.mxu1 %v2570_v34 }
  0xe0   :  { %2205 = vmatpush3.bf16.msra.mxu0 %v2555_v27 }
  0xe1   :  { %2206 = vmatprep.subr.bf16.mxu0 %v2556_v14 }
  0xe2   :  { %2227 = vmatpush3.bf16.msra.mxu1 %v2571_v35 }
  0xe3   :  { %2228 = vmatprep.subr.bf16.mxu1 %v2572_v37 }
  0xe4   :  { %2207 = vmatpush3.bf16.msra.mxu0 %v2557_v30  ;;  %v249_v30 = vrot.slane %v236_v2, %v248_v17 }
  0xe5   :  { %2208 = vmatprep.subr.bf16.mxu0 %v2558_v32  ;;  %v253_v32 = vrot.slane %v236_v2, %v252_v28 }
  0xe6   :  { %2229 = vmatpush3.bf16.msra.mxu1 %v2573_v42 }
  0xe7   :  { %2230 = vmatprep.subr.bf16.mxu1 %v2574_v46 }
  0xe8   :  { %2209 = vmatpush3.bf16.msra.mxu0 %v2559_v51 }
  0xe9   :  { %2210 = vmatprep.subr.bf16.mxu0 %v2560_v36 }
  0xea   :  { %2231 = vmatpush3.bf16.msra.mxu1 %v2575_v47 }
  0xeb   :  { %2232 = vmatprep.subr.bf16.mxu1 %v2576_v53 }
  0xec   :  { %2211 = vmatpush3.bf16.msra.mxu0 %v2561_v38 }
  0xed   :  { %2212 = vmatprep.subr.bf16.mxu0 %v2562_v6 }
  0xee   :  { %2233 = vmatpush3.bf16.msra.mxu1 %v2577_v54 }
  0xef   :  { %2234 = vmatprep.subr.bf16.mxu1 %v2578_v57 }
  0xf0   :  { %2213 = vmatpush3.bf16.msra.mxu0 %v2563_v39 }
  0xf1   :  { %2214 = vmatprep.subr.bf16.mxu0 %v2564_v40 }
  0xf2   :  { %2235 = vmatpush3.bf16.msra.mxu1 %v2579_v58 }
  0xf3   :  { %2236 = vmatprep.subr.bf16.mxu1 %v2580_v61 }
  0xf4   :  { %2215 = vmatpush3.bf16.msra.mxu0 %v2565_v41 }
  0xf6   :  { %2237 = vmatpush3.bf16.msra.mxu1 %v2581_v62 }
 0x10f   :  { %v1300_v33 = vpop.f32.mrf.mxu0 }
 0x110   :  { %v1341_v43 = vpop.f32.mrf.mxu1  ;;  %v1301_v8 = vadd.f32 %v1300_v33, %v241_v4 }
 0x111   :  { %v1302_v44 = vpop.f32.mrf.mxu0 }
 0x112   :  { %v1343_v45 = vpop.f32.mrf.mxu1  ;;  %v1303_v9 = vadd.f32 %v1302_v44, %v245_v5  ;;  %v1342_v10 = vadd.f32 %v1341_v43, %v1301_v8 }
 0x113   :  { %v1304_v48 = vpop.f32.mrf.mxu0 }
 0x114   :  { %v1345_v49 = vpop.f32.mrf.mxu1  ;;  %v1344_v12 = vadd.f32 %v1343_v45, %v1303_v9 }
 0x115   :  { %v1305_v50 = vpop.f32.mrf.mxu0 }
 0x116   :  { %v1346_v52 = vpop.f32.mrf.mxu1 }
 0x118   :  { %v1423_v55 = vpop.f32.mrf.mxu1 }
 0x11a   :  { %v1425_v56 = vpop.f32.mrf.mxu1 }
 0x11c   :  { %v1427_v59 = vpop.f32.mrf.mxu1 }
 0x11d   :  { %v2167_v59 = vld [vmem:[%s2823_s4] ss:$0 sm:$0xff] }
 0x11e   :  { %v1428_v60 = vpop.f32.mrf.mxu1 }
 0x14f   :  { %v1382_v11 = vpop.f32.mrf.mxu0 }
 0x150   :  { %v1383_v15 = vadd.f32 %v1382_v11, %v1342_v10 }
 0x151   :  { %v1384_v16 = vpop.f32.mrf.mxu0 }
 0x152   :  { %v1424_v18 = vadd.f32 %v1423_v55, %v1383_v15  ;;  %v1385_v19 = vadd.f32 %v1384_v16, %v1344_v12 }
 0x153   :  { %v1386_v20 = vpop.f32.mrf.mxu0 }
 0x154   :  { %v1426_v21 = vadd.f32 %v1425_v56, %v1385_v19  ;;  %v1594_v22 = vmax.f32 %v1424_v18, 0.0 }
 0x155   :  { %v1387_v23 = vpop.f32.mrf.mxu0 }
 0x156   :  { %v1595_v24 = vmax.f32 %v1426_v21, 0.0  ;;  %v1598_v7 = vpack.c.bf16 %v1594_v22, %v1594_v22 }
 0x158   :  { %v1464_v25 = vpop.f32.mrf.mxu1  ;;  %v1599_v26 = vpack.c.bf16 %v1595_v24, %v1595_v24 }
 0x159   :  { %v1465_v51 = vadd.f32 %v1464_v25, %v249_v30 }
 0x15a   :  { %v1466_v13 = vpop.f32.mrf.mxu1  ;;  %1897 = vmatprep.mubr.bf16.mxu0 %v1599_v26 }
 0x15b   :  { %1898 = vmatmul.mubr.bf16.vlgmr.msra.gmra.mxu0 %v1598_v7  ;;  %v1467_v36 = vadd.f32 %v1466_v13, %v253_v32 }
 0x15c   :  { %v1468_v27 = vpop.f32.mrf.mxu1 }
 0x15e   :  { %v1469_v14 = vpop.f32.mrf.mxu1 }
 0x18f   :  { %v1505_v29 = vpop.f32.mrf.mxu0 }
 0x190   :  { %v1506_v37 = vadd.f32 %v1505_v29, %v1465_v51 }
 0x191   :  { %v1507_v31 = vpop.f32.mrf.mxu0 }
 0x192   :  { %v1508_v39 = vadd.f32 %v1507_v31, %v1467_v36 }
 0x193   :  { %v1509_v34 = vpop.f32.mrf.mxu0 }
 0x195   :  { %v1510_v35 = vpop.f32.mrf.mxu0 }
 0x197   :  { %v1587_v6 = vpop.f32.mrf.mxu0 }
 0x198   :  { %v1546_v38 = vpop.f32.mrf.mxu1 }
 0x199   :  { %v1547_v40 = vadd.f32 %v1546_v38, %v1506_v37  ;;  %v1589_v42 = vpop.f32.mrf.mxu0 }
 0x19a   :  { %v1548_v41 = vpop.f32.mrf.mxu1 }
 0x19b   :  { %v1588_v33 = vadd.f32 %v1587_v6, %v1547_v40  ;;  %v1549_v43 = vadd.f32 %v1548_v41, %v1508_v39  ;;  %v1591_v45 = vpop.f32.mrf.mxu0 }
 0x19c   :  { %v1550_v44 = vpop.f32.mrf.mxu1 }
 0x19d   :  { %v1590_v46 = vadd.f32 %v1589_v42, %v1549_v43  ;;  %v1596_v47 = vmax.f32 %v1588_v33, 0.0  ;;  %v1592_v49 = vpop.f32.mrf.mxu0 }
 0x19e   :  { %v1551_v48 = vpop.f32.mrf.mxu1 }
 0x19f   :  { %v1597_v50 = vmax.f32 %v1590_v46, 0.0  ;;  %v1600_v53 = vpack.c.bf16 %v1596_v47, %v1596_v47 }
 0x1a1   :  { %v1601_v52 = vpack.c.bf16 %v1597_v50, %v1597_v50 }
 0x1a3   :  { %1937 = vmatprep.mubr.bf16.mxu1 %v1601_v52 }
 0x1a4   :  { %1938 = vmatmul.mubr.bf16.vlgmr.msra.gmra.mxu1 %v1600_v53 }
 0x21b   :  { %v2216_v54 = vpop.f32.mrf.mxu0 }
 0x21d   :  { %v2217_v55 = vpop.f32.mrf.mxu0 }
 0x21e   :  { %v2218_v56 = vadd.f32 %v2217_v55, %v2216_v54 }
 0x21f   :  { %v2219_v57 = vpop.f32.mrf.mxu0 }
 0x220   :  { %v1900_v62 = vadd.f32 %v2218_v56, %v2167_v59 }
 0x221   :  { %v2220_v58 = vpop.f32.mrf.mxu0 }
 0x264   :  { %v2238_v60 = vpop.f32.mrf.mxu1 }
 0x266   :  { %v2239_v61 = vpop.f32.mrf.mxu1 }
 0x267   :  { %v2240_v63 = vadd.f32 %v2239_v61, %v2238_v60 }
 0x268   :  { %v2241_v0 = vpop.f32.mrf.mxu1 }
 0x269   :  { %v1940_v1 = vadd.f32 %v2240_v63, %v1900_v62 }
 0x26a   :  { %v2242_v2 = vpop.f32.mrf.mxu1 }
 0x26b   :  { %1946 = vst.msk [vmem:[#allocation5] sm:$0xff] %vm1945_vm1, %v1940_v1 }
 0x26c   :  { %2613 = shalt.err (!%p2610_p9)
}
 0x26d   :  { %1956 = dma.vmem_to_hbm [thread:$0]  %s1954_s19, 128, %s2824_s5, [#allocation4]  }
 0x26e   :  { %2624 = dma.done.wait [#allocation4], 128  }
 0x26f   :  { %2625 = vsyncadd [#allocation4], 4294967168 }
 0x270   :  { %1960 = vsyncpa [#allocation3], 1 }
 0x271   :  { %1961 = vsyncpa [#allocation4], 1 }

</bundles_post_ra>
